<compile_context>
chip_gen: v7x
topology: tpu7x:2x2x1
jax: 0.10.0
libtpu: 0.0.40
codegen_flags: <defaults>
</compile_context>

<pallas_src>
import functools

import jax
import jax.numpy as jnp
from jax.experimental import pallas as pl
from jax.experimental.pallas import tpu as pltpu


def _sh_kernel(in_ref, out_ref, *, n_out):
    # in_ref:  (3,     S, 128) float32 -- coordinate-major, points packed (sublane, lane) dense
    # out_ref: (n_out, S, 128) out dtype -- n_out SH coefficients per point
    s_total = in_ref.shape[1]
    dt = out_ref.dtype
    CH = 8  # sublanes per chunk -> every intermediate is exactly one vreg

    for base in range(0, s_total, CH):
        rows = min(CH, s_total - base)
        sl = slice(base, base + rows)

        # tcnn maps [0,1] -> [-1,1]
        x = in_ref[0, sl, :] * 2.0 - 1.0
        y = in_ref[1, sl, :] * 2.0 - 1.0
        z = in_ref[2, sl, :] * 2.0 - 1.0

        # l = 0
        out_ref[0, sl, :] = jnp.full(x.shape, 0.28209479177387814, dt)

        if n_out > 1:
            # l = 1
            out_ref[1, sl, :] = (-0.48860251190291987 * y).astype(dt)
            out_ref[2, sl, :] = (0.48860251190291987 * z).astype(dt)
            out_ref[3, sl, :] = (-0.48860251190291987 * x).astype(dt)

        if n_out > 4:
            xy = x * y
            xz = x * z
            yz = y * z
            x2 = x * x
            y2 = y * y
            z2 = z * z
            # l = 2
            out_ref[4, sl, :] = (1.0925484305920792 * xy).astype(dt)
            out_ref[5, sl, :] = (-1.0925484305920792 * yz).astype(dt)
            out_ref[6, sl, :] = (0.94617469575755997 * z2 - 0.31539156525251999).astype(dt)
            out_ref[7, sl, :] = (-1.0925484305920792 * xz).astype(dt)
            out_ref[8, sl, :] = (0.54627421529603959 * (x2 - y2)).astype(dt)

        if n_out > 9:
            # l = 3
            out_ref[9, sl, :] = (0.59004358992664352 * y * (-3.0 * x2 + y2)).astype(dt)
            out_ref[10, sl, :] = (2.8906114426405538 * xy * z).astype(dt)
            out_ref[11, sl, :] = (0.45704579946446572 * y * (1.0 - 5.0 * z2)).astype(dt)
            out_ref[12, sl, :] = (0.3731763325901154 * z * (5.0 * z2 - 3.0)).astype(dt)
            out_ref[13, sl, :] = (0.45704579946446572 * x * (1.0 - 5.0 * z2)).astype(dt)
            out_ref[14, sl, :] = (1.4453057213202769 * z * (x2 - y2)).astype(dt)
            out_ref[15, sl, :] = (0.59004358992664352 * x * (-x2 + 3.0 * y2)).astype(dt)


def _round_up(a, b):
    return (a + b - 1) // b * b


@functools.partial(
    jax.jit, static_argnames=("degree", "tile_n", "out_dtype", "channels_last")
)
def spherical_harmonics_encoding(
    in_tensor,
    degree: int = 4,
    tile_n: int = 65536,
    out_dtype=jnp.float32,
    channels_last: bool = True,
):
    """JAX/Pallas equivalent of SphericalHarmonicsEncoding.forward.

    in_tensor: (..., 3) array of directions in [0, 1]^3.
    returns:   (..., degree**2) float32 SH encoding if channels_last (module
               contract), else the coefficient-major (degree**2, ...) layout
               (no output transpose; lets a downstream matmul fuse the layout).
    """
    assert 1 <= degree <= 4, "degrees 1..4 implemented (module default is 4)"
    assert tile_n > 0 and tile_n % 1024 == 0, "tile_n must be a positive multiple of 1024"
    # Default tile keeps double-buffered VMEM usage (~9.5 MiB) under the default
    # scoped-VMEM limit on every chip generation; larger tiles would need
    # pltpu.CompilerParams(vmem_limit_bytes=...).
    assert tile_n <= 65536, "raise vmem_limit_bytes before using tiles > 65536"
    assert in_tensor.shape[-1] == 3, "last dim must be 3 (directions)"
    n_out = degree * degree

    bs = in_tensor.shape[:-1]
    pts = in_tensor.reshape(-1, 3).astype(jnp.float32)
    m = pts.shape[0]
    if m == 0:
        zeros = jnp.zeros((n_out, 0), out_dtype)
        return (
            zeros.T.reshape(*bs, n_out) if channels_last else zeros.reshape(n_out, *bs)
        )

    m_pad128 = _round_up(m, 128)
    if m_pad128 <= tile_n:
        # Single grid step: block == full array, no divisibility constraint.
        grid_n = 1
        tile_eff = m_pad128
    else:
        # Balance the tile across grid steps so inputs just over a tile boundary
        # don't pay up to a full tile of padding, while staying near tile_n so the
        # ~0.35us per-step overhead stays amortized.
        grid_n = -(-m_pad128 // tile_n)
        tile_eff = _round_up(-(-m_pad128 // grid_n), 1024)
    m_pad = grid_n * tile_eff
    if m_pad != m:
        pts = jnp.pad(pts, ((0, m_pad - m), (0, 0)))

    # Coordinate-major, (sublane, lane)-dense layout: (3, m_pad//128, 128).
    pts_cm = pts.T.reshape(3, m_pad // 128, 128)

    s_tile = tile_eff // 128

    out_cm = pl.pallas_call(
        functools.partial(_sh_kernel, n_out=n_out),
        out_shape=jax.ShapeDtypeStruct((n_out, m_pad // 128, 128), out_dtype),
        grid=(grid_n,),
        in_specs=[pl.BlockSpec((3, s_tile, 128), lambda i: (0, i, 0))],
        out_specs=pl.BlockSpec((n_out, s_tile, 128), lambda i: (0, i, 0)),
        compiler_params=pltpu.CompilerParams(
            dimension_semantics=("parallel",)
        ),
    )(pts_cm)

    out_cm = out_cm.reshape(n_out, m_pad)
    if channels_last:
        # TODO(synk): this XLA transpose is the dominant remaining HBM cost
        # (reads+writes the full output once more); consumers that can take the
        # (n_out, M) layout should call with channels_last=False and fuse it.
        return out_cm[:, :m].T.reshape(*bs, n_out)
    return out_cm[:, :m].reshape(n_out, *bs)


def _reference_sh_deg4(in_tensor):
    """Pure-JAX reference (same math) for a correctness check."""
    v = in_tensor.astype(jnp.float32) * 2.0 - 1.0
    x, y, z = v[..., 0], v[..., 1], v[..., 2]
    xy, xz, yz = x * y, x * z, y * z
    x2, y2, z2 = x * x, y * y, z * z
    ones = jnp.ones_like(x)
    cols = [
        0.28209479177387814 * ones,
        -0.48860251190291987 * y,
        0.48860251190291987 * z,
        -0.48860251190291987 * x,
        1.0925484305920792 * xy,
        -1.0925484305920792 * yz,
        0.94617469575755997 * z2 - 0.31539156525251999,
        -1.0925484305920792 * xz,
        0.54627421529603959 * (x2 - y2),
        0.59004358992664352 * y * (-3.0 * x2 + y2),
        2.8906114426405538 * xy * z,
        0.45704579946446572 * y * (1.0 - 5.0 * z2),
        0.3731763325901154 * z * (5.0 * z2 - 3.0),
        0.45704579946446572 * x * (1.0 - 5.0 * z2),
        1.4453057213202769 * z * (x2 - y2),
        0.59004358992664352 * x * (-x2 + 3.0 * y2),
    ]
    return jnp.stack(cols, axis=-1)


if __name__ == "__main__":
    # No learnable parameters in this module (SH encoding is parameter-free).
    key = jax.random.PRNGKey(0)
    # batch=2, channels=4, spatial=16 points, each a 3-D direction in [0,1]^3
    x = jax.random.uniform(key, (2, 4, 16, 3), dtype=jnp.float32)

    out = spherical_harmonics_encoding(x, degree=4)
    out = jax.block_until_ready(out)

    assert out.shape == (2, 4, 16, 16), out.shape
    assert out.dtype == jnp.float32, out.dtype

    ref = _reference_sh_deg4(x)
    assert jnp.allclose(out, ref, atol=1e-5, rtol=1e-5), "mismatch vs reference"

    # Coefficient-major fast path must agree too.
    out_cm = spherical_harmonics_encoding(x, degree=4, channels_last=False)
    out_cm = jax.block_until_ready(out_cm)
    assert out_cm.shape == (16, 2, 4, 16), out_cm.shape
    assert jnp.allclose(jnp.moveaxis(out_cm, 0, -1), ref, atol=1e-5, rtol=1e-5)

    print("KERNEL_OK")
</pallas_src>

<mosaic_0001>
module attributes {stable_mosaic.version = 11 : i64} {
  func.func @_sh_kernel(%arg0: i32, %arg1: memref<3x1x128xf32, #tpu.memory_space<vmem>>, %arg2: memref<16x1x128xf32, #tpu.memory_space<vmem>>) attributes {dimension_semantics = [#tpu.dimension_semantics<parallel>], iteration_bounds = array<i64: 1>, scalar_prefetch = 0 : i64, scratch_operands = 0 : i64, tpu.core_type = #tpu.core_type<tc>, window_params = [{transform_indices = @transform_0, window_bounds = array<i64: 3, 1, 128>}, {transform_indices = @transform_1, window_bounds = array<i64: 16, 1, 128>}]} {
    %c0 = arith.constant 0 : index
    %c0_0 = arith.constant 0 : index
    %c0_1 = arith.constant 0 : index
    %0 = vector.load %arg1[%c0, %c0_0, %c0_1] : memref<3x1x128xf32, #tpu.memory_space<vmem>>, vector<1x1x128xf32>
    %1 = vector.shape_cast %0 : vector<1x1x128xf32> to vector<1x128xf32>
    %cst = arith.constant 2.000000e+00 : f32
    %2 = vector.broadcast %cst : f32 to vector<1x128xf32>
    %3 = arith.mulf %1, %2 : vector<1x128xf32>
    %cst_2 = arith.constant 1.000000e+00 : f32
    %4 = vector.broadcast %cst_2 : f32 to vector<1x128xf32>
    %5 = arith.subf %3, %4 : vector<1x128xf32>
    %c1 = arith.constant 1 : index
    %c0_3 = arith.constant 0 : index
    %c0_4 = arith.constant 0 : index
    %6 = vector.load %arg1[%c1, %c0_3, %c0_4] : memref<3x1x128xf32, #tpu.memory_space<vmem>>, vector<1x1x128xf32>
    %7 = vector.shape_cast %6 : vector<1x1x128xf32> to vector<1x128xf32>
    %cst_5 = arith.constant 2.000000e+00 : f32
    %8 = vector.broadcast %cst_5 : f32 to vector<1x128xf32>
    %9 = arith.mulf %7, %8 : vector<1x128xf32>
    %cst_6 = arith.constant 1.000000e+00 : f32
    %10 = vector.broadcast %cst_6 : f32 to vector<1x128xf32>
    %11 = arith.subf %9, %10 : vector<1x128xf32>
    %c2 = arith.constant 2 : index
    %c0_7 = arith.constant 0 : index
    %c0_8 = arith.constant 0 : index
    %12 = vector.load %arg1[%c2, %c0_7, %c0_8] : memref<3x1x128xf32, #tpu.memory_space<vmem>>, vector<1x1x128xf32>
    %13 = vector.shape_cast %12 : vector<1x1x128xf32> to vector<1x128xf32>
    %cst_9 = arith.constant 2.000000e+00 : f32
    %14 = vector.broadcast %cst_9 : f32 to vector<1x128xf32>
    %15 = arith.mulf %13, %14 : vector<1x128xf32>
    %cst_10 = arith.constant 1.000000e+00 : f32
    %16 = vector.broadcast %cst_10 : f32 to vector<1x128xf32>
    %17 = arith.subf %15, %16 : vector<1x128xf32>
    %cst_11 = arith.constant 0.282094806 : f32
    %18 = vector.broadcast %cst_11 : f32 to vector<1x128xf32>
    %c0_12 = arith.constant 0 : index
    %c0_13 = arith.constant 0 : index
    %c0_14 = arith.constant 0 : index
    %19 = vector.load %arg2[%c0_12, %c0_13, %c0_14] : memref<16x1x128xf32, #tpu.memory_space<vmem>>, vector<1x1x128xf32>
    %20 = vector.shape_cast %19 : vector<1x1x128xf32> to vector<1x128xf32>
    %21 = vector.shape_cast %18 : vector<1x128xf32> to vector<1x1x128xf32>
    tpu.vector_store %arg2[%c0_12, %c0_13, %c0_14], %21 {strides = array<i32>} : memref<16x1x128xf32, #tpu.memory_space<vmem>>, vector<1x1x128xf32>,
    %cst_15 = arith.constant -0.488602519 : f32
    %22 = vector.broadcast %cst_15 : f32 to vector<1x128xf32>
    %23 = arith.mulf %22, %11 : vector<1x128xf32>
    %c1_16 = arith.constant 1 : index
    %c0_17 = arith.constant 0 : index
    %c0_18 = arith.constant 0 : index
    %24 = vector.load %arg2[%c1_16, %c0_17, %c0_18] : memref<16x1x128xf32, #tpu.memory_space<vmem>>, vector<1x1x128xf32>
    %25 = vector.shape_cast %24 : vector<1x1x128xf32> to vector<1x128xf32>
    %26 = vector.shape_cast %23 : vector<1x128xf32> to vector<1x1x128xf32>
    tpu.vector_store %arg2[%c1_16, %c0_17, %c0_18], %26 {strides = array<i32>} : memref<16x1x128xf32, #tpu.memory_space<vmem>>, vector<1x1x128xf32>,
    %cst_19 = arith.constant 0.488602519 : f32
    %27 = vector.broadcast %cst_19 : f32 to vector<1x128xf32>
    %28 = arith.mulf %27, %17 : vector<1x128xf32>
    %c2_20 = arith.constant 2 : index
    %c0_21 = arith.constant 0 : index
    %c0_22 = arith.constant 0 : index
    %29 = vector.load %arg2[%c2_20, %c0_21, %c0_22] : memref<16x1x128xf32, #tpu.memory_space<vmem>>, vector<1x1x128xf32>
    %30 = vector.shape_cast %29 : vector<1x1x128xf32> to vector<1x128xf32>
    %31 = vector.shape_cast %28 : vector<1x128xf32> to vector<1x1x128xf32>
    tpu.vector_store %arg2[%c2_20, %c0_21, %c0_22], %31 {strides = array<i32>} : memref<16x1x128xf32, #tpu.memory_space<vmem>>, vector<1x1x128xf32>,
    %cst_23 = arith.constant -0.488602519 : f32
    %32 = vector.broadcast %cst_23 : f32 to vector<1x128xf32>
    %33 = arith.mulf %32, %5 : vector<1x128xf32>
    %c3 = arith.constant 3 : index
    %c0_24 = arith.constant 0 : index
    %c0_25 = arith.constant 0 : index
    %34 = vector.load %arg2[%c3, %c0_24, %c0_25] : memref<16x1x128xf32, #tpu.memory_space<vmem>>, vector<1x1x128xf32>
    %35 = vector.shape_cast %34 : vector<1x1x128xf32> to vector<1x128xf32>
    %36 = vector.shape_cast %33 : vector<1x128xf32> to vector<1x1x128xf32>
    tpu.vector_store %arg2[%c3, %c0_24, %c0_25], %36 {strides = array<i32>} : memref<16x1x128xf32, #tpu.memory_space<vmem>>, vector<1x1x128xf32>,
    %37 = arith.mulf %5, %11 : vector<1x128xf32>
    %38 = arith.mulf %5, %17 : vector<1x128xf32>
    %39 = arith.mulf %11, %17 : vector<1x128xf32>
    %40 = arith.mulf %5, %5 : vector<1x128xf32>
    %41 = arith.mulf %11, %11 : vector<1x128xf32>
    %42 = arith.mulf %17, %17 : vector<1x128xf32>
    %cst_26 = arith.constant 1.09254849 : f32
    %43 = vector.broadcast %cst_26 : f32 to vector<1x128xf32>
    %44 = arith.mulf %43, %37 : vector<1x128xf32>
    %c4 = arith.constant 4 : index
    %c0_27 = arith.constant 0 : index
    %c0_28 = arith.constant 0 : index
    %45 = vector.load %arg2[%c4, %c0_27, %c0_28] : memref<16x1x128xf32, #tpu.memory_space<vmem>>, vector<1x1x128xf32>
    %46 = vector.shape_cast %45 : vector<1x1x128xf32> to vector<1x128xf32>
    %47 = vector.shape_cast %44 : vector<1x128xf32> to vector<1x1x128xf32>
    tpu.vector_store %arg2[%c4, %c0_27, %c0_28], %47 {strides = array<i32>} : memref<16x1x128xf32, #tpu.memory_space<vmem>>, vector<1x1x128xf32>,
    %cst_29 = arith.constant -1.09254849 : f32
    %48 = vector.broadcast %cst_29 : f32 to vector<1x128xf32>
    %49 = arith.mulf %48, %39 : vector<1x128xf32>
    %c5 = arith.constant 5 : index
    %c0_30 = arith.constant 0 : index
    %c0_31 = arith.constant 0 : index
    %50 = vector.load %arg2[%c5, %c0_30, %c0_31] : memref<16x1x128xf32, #tpu.memory_space<vmem>>, vector<1x1x128xf32>
    %51 = vector.shape_cast %50 : vector<1x1x128xf32> to vector<1x128xf32>
    %52 = vector.shape_cast %49 : vector<1x128xf32> to vector<1x1x128xf32>
    tpu.vector_store %arg2[%c5, %c0_30, %c0_31], %52 {strides = array<i32>} : memref<16x1x128xf32, #tpu.memory_space<vmem>>, vector<1x1x128xf32>,
    %cst_32 = arith.constant 0.946174681 : f32
    %53 = vector.broadcast %cst_32 : f32 to vector<1x128xf32>
    %54 = arith.mulf %53, %42 : vector<1x128xf32>
    %cst_33 = arith.constant 0.31539157 : f32
    %55 = vector.broadcast %cst_33 : f32 to vector<1x128xf32>
    %56 = arith.subf %54, %55 : vector<1x128xf32>
    %c6 = arith.constant 6 : index
    %c0_34 = arith.constant 0 : index
    %c0_35 = arith.constant 0 : index
    %57 = vector.load %arg2[%c6, %c0_34, %c0_35] : memref<16x1x128xf32, #tpu.memory_space<vmem>>, vector<1x1x128xf32>
    %58 = vector.shape_cast %57 : vector<1x1x128xf32> to vector<1x128xf32>
    %59 = vector.shape_cast %56 : vector<1x128xf32> to vector<1x1x128xf32>
    tpu.vector_store %arg2[%c6, %c0_34, %c0_35], %59 {strides = array<i32>} : memref<16x1x128xf32, #tpu.memory_space<vmem>>, vector<1x1x128xf32>,
    %cst_36 = arith.constant -1.09254849 : f32
    %60 = vector.broadcast %cst_36 : f32 to vector<1x128xf32>
    %61 = arith.mulf %60, %38 : vector<1x128xf32>
    %c7 = arith.constant 7 : index
    %c0_37 = arith.constant 0 : index
    %c0_38 = arith.constant 0 : index
    %62 = vector.load %arg2[%c7, %c0_37, %c0_38] : memref<16x1x128xf32, #tpu.memory_space<vmem>>, vector<1x1x128xf32>
    %63 = vector.shape_cast %62 : vector<1x1x128xf32> to vector<1x128xf32>
    %64 = vector.shape_cast %61 : vector<1x128xf32> to vector<1x1x128xf32>
    tpu.vector_store %arg2[%c7, %c0_37, %c0_38], %64 {strides = array<i32>} : memref<16x1x128xf32, #tpu.memory_space<vmem>>, vector<1x1x128xf32>,
    %65 = arith.subf %40, %41 : vector<1x128xf32>
    %cst_39 = arith.constant 0.546274245 : f32
    %66 = vector.broadcast %cst_39 : f32 to vector<1x128xf32>
    %67 = arith.mulf %66, %65 : vector<1x128xf32>
    %c8 = arith.constant 8 : index
    %c0_40 = arith.constant 0 : index
    %c0_41 = arith.constant 0 : index
    %68 = vector.load %arg2[%c8, %c0_40, %c0_41] : memref<16x1x128xf32, #tpu.memory_space<vmem>>, vector<1x1x128xf32>
    %69 = vector.shape_cast %68 : vector<1x1x128xf32> to vector<1x128xf32>
    %70 = vector.shape_cast %67 : vector<1x128xf32> to vector<1x1x128xf32>
    tpu.vector_store %arg2[%c8, %c0_40, %c0_41], %70 {strides = array<i32>} : memref<16x1x128xf32, #tpu.memory_space<vmem>>, vector<1x1x128xf32>,
    %cst_42 = arith.constant 0.590043604 : f32
    %71 = vector.broadcast %cst_42 : f32 to vector<1x128xf32>
    %72 = arith.mulf %71, %11 : vector<1x128xf32>
    %cst_43 = arith.constant -3.000000e+00 : f32
    %73 = vector.broadcast %cst_43 : f32 to vector<1x128xf32>
    %74 = arith.mulf %73, %40 : vector<1x128xf32>
    %75 = arith.addf %74, %41 : vector<1x128xf32>
    %76 = arith.mulf %72, %75 : vector<1x128xf32>
    %c9 = arith.constant 9 : index
    %c0_44 = arith.constant 0 : index
    %c0_45 = arith.constant 0 : index
    %77 = vector.load %arg2[%c9, %c0_44, %c0_45] : memref<16x1x128xf32, #tpu.memory_space<vmem>>, vector<1x1x128xf32>
    %78 = vector.shape_cast %77 : vector<1x1x128xf32> to vector<1x128xf32>
    %79 = vector.shape_cast %76 : vector<1x128xf32> to vector<1x1x128xf32>
    tpu.vector_store %arg2[%c9, %c0_44, %c0_45], %79 {strides = array<i32>} : memref<16x1x128xf32, #tpu.memory_space<vmem>>, vector<1x1x128xf32>,
    %cst_46 = arith.constant 2.89061141 : f32
    %80 = vector.broadcast %cst_46 : f32 to vector<1x128xf32>
    %81 = arith.mulf %80, %37 : vector<1x128xf32>
    %82 = arith.mulf %81, %17 : vector<1x128xf32>
    %c10 = arith.constant 10 : index
    %c0_47 = arith.constant 0 : index
    %c0_48 = arith.constant 0 : index
    %83 = vector.load %arg2[%c10, %c0_47, %c0_48] : memref<16x1x128xf32, #tpu.memory_space<vmem>>, vector<1x1x128xf32>
    %84 = vector.shape_cast %83 : vector<1x1x128xf32> to vector<1x128xf32>
    %85 = vector.shape_cast %82 : vector<1x128xf32> to vector<1x1x128xf32>
    tpu.vector_store %arg2[%c10, %c0_47, %c0_48], %85 {strides = array<i32>} : memref<16x1x128xf32, #tpu.memory_space<vmem>>, vector<1x1x128xf32>,
    %cst_49 = arith.constant 0.457045794 : f32
    %86 = vector.broadcast %cst_49 : f32 to vector<1x128xf32>
    %87 = arith.mulf %86, %11 : vector<1x128xf32>
    %cst_50 = arith.constant 5.000000e+00 : f32
    %88 = vector.broadcast %cst_50 : f32 to vector<1x128xf32>
    %89 = arith.mulf %88, %42 : vector<1x128xf32>
    %cst_51 = arith.constant 1.000000e+00 : f32
    %90 = vector.broadcast %cst_51 : f32 to vector<1x128xf32>
    %91 = arith.subf %90, %89 : vector<1x128xf32>
    %92 = arith.mulf %87, %91 : vector<1x128xf32>
    %c11 = arith.constant 11 : index
    %c0_52 = arith.constant 0 : index
    %c0_53 = arith.constant 0 : index
    %93 = vector.load %arg2[%c11, %c0_52, %c0_53] : memref<16x1x128xf32, #tpu.memory_space<vmem>>, vector<1x1x128xf32>
    %94 = vector.shape_cast %93 : vector<1x1x128xf32> to vector<1x128xf32>
    %95 = vector.shape_cast %92 : vector<1x128xf32> to vector<1x1x128xf32>
    tpu.vector_store %arg2[%c11, %c0_52, %c0_53], %95 {strides = array<i32>} : memref<16x1x128xf32, #tpu.memory_space<vmem>>, vector<1x1x128xf32>,
    %cst_54 = arith.constant 0.373176336 : f32
    %96 = vector.broadcast %cst_54 : f32 to vector<1x128xf32>
    %97 = arith.mulf %96, %17 : vector<1x128xf32>
    %cst_55 = arith.constant 5.000000e+00 : f32
    %98 = vector.broadcast %cst_55 : f32 to vector<1x128xf32>
    %99 = arith.mulf %98, %42 : vector<1x128xf32>
    %cst_56 = arith.constant 3.000000e+00 : f32
    %100 = vector.broadcast %cst_56 : f32 to vector<1x128xf32>
    %101 = arith.subf %99, %100 : vector<1x128xf32>
    %102 = arith.mulf %97, %101 : vector<1x128xf32>
    %c12 = arith.constant 12 : index
    %c0_57 = arith.constant 0 : index
    %c0_58 = arith.constant 0 : index
    %103 = vector.load %arg2[%c12, %c0_57, %c0_58] : memref<16x1x128xf32, #tpu.memory_space<vmem>>, vector<1x1x128xf32>
    %104 = vector.shape_cast %103 : vector<1x1x128xf32> to vector<1x128xf32>
    %105 = vector.shape_cast %102 : vector<1x128xf32> to vector<1x1x128xf32>
    tpu.vector_store %arg2[%c12, %c0_57, %c0_58], %105 {strides = array<i32>} : memref<16x1x128xf32, #tpu.memory_space<vmem>>, vector<1x1x128xf32>,
    %cst_59 = arith.constant 0.457045794 : f32
    %106 = vector.broadcast %cst_59 : f32 to vector<1x128xf32>
    %107 = arith.mulf %106, %5 : vector<1x128xf32>
    %cst_60 = arith.constant 5.000000e+00 : f32
    %108 = vector.broadcast %cst_60 : f32 to vector<1x128xf32>
    %109 = arith.mulf %108, %42 : vector<1x128xf32>
    %cst_61 = arith.constant 1.000000e+00 : f32
    %110 = vector.broadcast %cst_61 : f32 to vector<1x128xf32>
    %111 = arith.subf %110, %109 : vector<1x128xf32>
    %112 = arith.mulf %107, %111 : vector<1x128xf32>
    %c13 = arith.constant 13 : index
    %c0_62 = arith.constant 0 : index
    %c0_63 = arith.constant 0 : index
    %113 = vector.load %arg2[%c13, %c0_62, %c0_63] : memref<16x1x128xf32, #tpu.memory_space<vmem>>, vector<1x1x128xf32>
    %114 = vector.shape_cast %113 : vector<1x1x128xf32> to vector<1x128xf32>
    %115 = vector.shape_cast %112 : vector<1x128xf32> to vector<1x1x128xf32>
    tpu.vector_store %arg2[%c13, %c0_62, %c0_63], %115 {strides = array<i32>} : memref<16x1x128xf32, #tpu.memory_space<vmem>>, vector<1x1x128xf32>,
    %cst_64 = arith.constant 1.44530571 : f32
    %116 = vector.broadcast %cst_64 : f32 to vector<1x128xf32>
    %117 = arith.mulf %116, %17 : vector<1x128xf32>
    %118 = arith.subf %40, %41 : vector<1x128xf32>
    %119 = arith.mulf %117, %118 : vector<1x128xf32>
    %c14 = arith.constant 14 : index
    %c0_65 = arith.constant 0 : index
    %c0_66 = arith.constant 0 : index
    %120 = vector.load %arg2[%c14, %c0_65, %c0_66] : memref<16x1x128xf32, #tpu.memory_space<vmem>>, vector<1x1x128xf32>
    %121 = vector.shape_cast %120 : vector<1x1x128xf32> to vector<1x128xf32>
    %122 = vector.shape_cast %119 : vector<1x128xf32> to vector<1x1x128xf32>
    tpu.vector_store %arg2[%c14, %c0_65, %c0_66], %122 {strides = array<i32>} : memref<16x1x128xf32, #tpu.memory_space<vmem>>, vector<1x1x128xf32>,
    %cst_67 = arith.constant 0.590043604 : f32
    %123 = vector.broadcast %cst_67 : f32 to vector<1x128xf32>
    %124 = arith.mulf %123, %5 : vector<1x128xf32>
    %cst_68 = arith.constant 0.000000e+00 : f32
    %125 = vector.broadcast %cst_68 : f32 to vector<1x128xf32>
    %126 = arith.subf %125, %40 : vector<1x128xf32>
    %cst_69 = arith.constant 3.000000e+00 : f32
    %127 = vector.broadcast %cst_69 : f32 to vector<1x128xf32>
    %128 = arith.mulf %127, %41 : vector<1x128xf32>
    %129 = arith.addf %126, %128 : vector<1x128xf32>
    %130 = arith.mulf %124, %129 : vector<1x128xf32>
    %c15 = arith.constant 15 : index
    %c0_70 = arith.constant 0 : index
    %c0_71 = arith.constant 0 : index
    %131 = vector.load %arg2[%c15, %c0_70, %c0_71] : memref<16x1x128xf32, #tpu.memory_space<vmem>>, vector<1x1x128xf32>
    %132 = vector.shape_cast %131 : vector<1x1x128xf32> to vector<1x128xf32>
    %133 = vector.shape_cast %130 : vector<1x128xf32> to vector<1x1x128xf32>
    tpu.vector_store %arg2[%c15, %c0_70, %c0_71], %133 {strides = array<i32>} : memref<16x1x128xf32, #tpu.memory_space<vmem>>, vector<1x1x128xf32>,
    return
  }
  func.func @transform_0(%arg0: i32) -> (i32, i32, i32) {
    %c0_i32 = arith.constant 0 : i32
    %c0_i32_0 = arith.constant 0 : i32
    %c0_i32_1 = arith.constant 0 : i32
    return %c0_i32, %arg0, %c0_i32_0 : i32, i32, i32
  }
  func.func @transform_1(%arg0: i32) -> (i32, i32, i32) {
    %c0_i32 = arith.constant 0 : i32
    %c0_i32_0 = arith.constant 0 : i32
    %c0_i32_1 = arith.constant 0 : i32
    return %c0_i32, %arg0, %c0_i32_0 : i32, i32, i32
  }
}

</mosaic_0001>

<bundles_post_ra>
// kernel: spherical_harmonics_encoding.1
= control target key start
LH: loop header
LB: loop body
LE: loop exit
PB: predicated region body
PF: predicated region fallthrough
CT: control target
= control target key end

     0   :  { %v115_v0 = vmov 0.2820948   ;;  %s183_s1 = inlined_call_operand.vmem [shape: f32[16,1,128], index: 1, kind: output, shape index: {}]   ;;  %s184_s0 = inlined_call_operand.vmem [shape: f32[3,1,128], index: 0, kind: input, shape index: {}]  }
   0x1   :  { %19 = vst [vmem:[%s183_s1] sm:$0x1] %v115_v0  ;;  %v93_v1 = vld [vmem:[%s184_s0 + $0x1] sm:$0x1]  ;;  %v95_v2 = vld [vmem:[%s184_s0 + $0x2] sm:$0x1] }
   0x2   :  { %v8_v3 = vld [vmem:[%s184_s0] sm:$0x1]  ;;  %v13_v4 = vmul.f32 2.0, %v93_v1  ;;  %v17_v5 = vmul.f32 2.0, %v95_v2 }
   0x3   :  { %v9_v6 = vmul.f32 2.0, %v8_v3 }
   0x4   :  { %v94_v7 = vadd.f32 -1.0, %v13_v4  ;;  %v96_v8 = vadd.f32 -1.0, %v17_v5 }
   0x5   :  { %v92_v9 = vadd.f32 -1.0, %v9_v6 }
   0x6   :  { %v20_v10 = vmul.f32 -0.48860252, %v94_v7  ;;  %v23_v11 = vmul.f32 0.48860252, %v96_v8  ;;  %v31_v14 = vmul.f32 %v96_v8, %v94_v7  ;;  %v34_v15 = vmul.f32 %v96_v8, %v96_v8 }
   0x7   :  { %v26_v12 = vmul.f32 -0.48860252, %v92_v9  ;;  %v29_v13 = vmul.f32 %v94_v7, %v92_v9  ;;  %v30_v16 = vmul.f32 %v96_v8, %v92_v9  ;;  %v32_v17 = vmul.f32 %v92_v9, %v92_v9 }
   0x8   :  { %97 = vst [vmem:[%s183_s1 + $0x1] sm:$0x1] %v20_v10  ;;  %98 = vst [vmem:[%s183_s1 + $0x2] sm:$0x1] %v23_v11  ;;  %v33_v19 = vmul.f32 %v94_v7, %v94_v7  ;;  %v52_v20 = vmul.f32 0.5900436, %v94_v7 }
   0x9   :  { %99 = vst [vmem:[%s183_s1 + $0x3] sm:$0x1] %v26_v12  ;;  %v35_v18 = vmul.f32 1.0925485, %v29_v13  ;;  %v58_v21 = vmul.f32 2.8906114, %v29_v13 }
   0xa   :  { %v38_v22 = vmul.f32 -1.0925485, %v31_v14  ;;  %v41_v23 = vmul.f32 0.9461747, %v34_v15  ;;  %v45_v24 = vmul.f32 -1.0925485, %v30_v16  ;;  %v48_v25 = vsub.f32 %v32_v17, %v33_v19 }
   0xb   :  { %100 = vst [vmem:[%s183_s1 + $0x4] sm:$0x1] %v35_v18  ;;  %v53_v26 = vmul.f32 -3.0, %v32_v17  ;;  %v59_v27 = vmul.f32 %v96_v8, %v58_v21  ;;  %v62_v28 = vmul.f32 0.4570458, %v94_v7  ;;  %v63_v30 = vmul.f32 5.0, %v34_v15 }
   0xc   :  { %101 = vst [vmem:[%s183_s1 + $0x5] sm:$0x1] %v38_v22  ;;  %v102_v29 = vadd.f32 -0.31539157, %v41_v23  ;;  %104 = vst [vmem:[%s183_s1 + $0x7] sm:$0x1] %v45_v24 }
   0xd   :  { %v68_v31 = vmul.f32 0.37317634, %v96_v8  ;;  %v82_v32 = vsub.f32 0.0, %v32_v17  ;;  %v49_v33 = vmul.f32 0.54627424, %v48_v25  ;;  %v54_v34 = vadd.f32 %v53_v26, %v33_v19 }
   0xe   :  { %107 = vst [vmem:[%s183_s1 + $0xa] sm:$0x1] %v59_v27  ;;  %v73_v35 = vmul.f32 0.4570458, %v92_v9  ;;  %v77_v36 = vmul.f32 1.4453057, %v96_v8 }
   0xf   :  { %103 = vst [vmem:[%s183_s1 + $0x6] sm:$0x1] %v102_v29  ;;  %v64_v37 = vsub.f32 1.0, %v63_v30  ;;  %v109_v38 = vadd.f32 -3.0, %v63_v30  ;;  %v81_v39 = vmul.f32 0.5900436, %v92_v9  ;;  %v55_v41 = vmul.f32 %v54_v34, %v52_v20 }
  0x10   :  { %v83_v40 = vmul.f32 3.0, %v33_v19  ;;  %105 = vst [vmem:[%s183_s1 + $0x8] sm:$0x1] %v49_v33  ;;  %v78_v42 = vmul.f32 %v77_v36, %v48_v25 }
  0x11   :  { %v65_v43 = vmul.f32 %v64_v37, %v62_v28  ;;  %v70_v44 = vmul.f32 %v109_v38, %v68_v31  ;;  %v74_v45 = vmul.f32 %v73_v35, %v64_v37  ;;  %106 = vst [vmem:[%s183_s1 + $0x9] sm:$0x1] %v55_v41 }
  0x12   :  { %v84_v46 = vadd.f32 %v83_v40, %v82_v32  ;;  %112 = vst [vmem:[%s183_s1 + $0xe] sm:$0x1] %v78_v42 }
  0x13   :  { %108 = vst [vmem:[%s183_s1 + $0xb] sm:$0x1] %v65_v43  ;;  %110 = vst [vmem:[%s183_s1 + $0xc] sm:$0x1] %v70_v44 }
  0x14   :  { %111 = vst [vmem:[%s183_s1 + $0xd] sm:$0x1] %v74_v45  ;;  %v85_v47 = vmul.f32 %v84_v46, %v81_v39 }
  0x16   :  { %113 = vst [vmem:[%s183_s1 + $0xf] sm:$0x1] %v85_v47 }

</bundles_post_ra>
